<compile_context>
chip_gen: v6e
topology: v6e:2x2x1
jax: 0.10.0
libtpu: 0.0.40
codegen_flags: <defaults>
</compile_context>

<pallas_src>
import functools

import jax
import jax.numpy as jnp
from jax.experimental import pallas as pl
from jax.experimental.pallas import tpu as pltpu


def intention_classifier_kernel(ctx_ref, tp_ref, prof_ref, w_ref, b_ref, out_ref,
                                *, inv_sent_num):
    # ctx_ref : (bs, H)            context_rep            (f32)
    # tp_ref  : (bs, H)            tp_rep                 (f32)
    # prof_ref: (bs, sent_num, H)  profile_pooled viewed  (f32)
    # w_ref   : (3H, TN)           weight slab (input-major, bf16 or f32)
    # b_ref   : (1, TN)            bias slab              (f32)
    # out_ref : (bs, TN)
    H = ctx_ref.shape[1]
    wdt = w_ref.dtype

    # torch.mean(profile_pooled, dim=1): sum in f32 (cheap VPU adds over sent_num
    # sublane planes); the 1/sent_num scale is folded into the third partial product.
    prof_sum = jnp.sum(prof_ref[...], axis=1)  # (bs, H), f32

    # concat([ctx, tp, mean]) @ W  ==  ctx @ W[0:H] + tp @ W[H:2H] + mean @ W[2H:3H]
    # Feed the MXU directly from aligned ref slices — no full-weight materialization.
    acc = jnp.dot(ctx_ref[...].astype(wdt), w_ref[0:H, :],
                  preferred_element_type=jnp.float32)
    acc = acc + jnp.dot(tp_ref[...].astype(wdt), w_ref[H:2 * H, :],
                        preferred_element_type=jnp.float32)
    acc = acc + inv_sent_num * jnp.dot(prof_sum.astype(wdt), w_ref[2 * H:3 * H, :],
                                       preferred_element_type=jnp.float32)

    out_ref[...] = (acc + b_ref[...]).astype(out_ref.dtype)


def intention_classifier(context_rep, tp_rep, profile_pooled, weight, bias,
                         bs, sent_num, word_num, *,
                         weight_dtype=jnp.bfloat16, tn=None):
    """JAX wrapper mirroring IntentionClassifier.forward.

    context_rep    : (bs, H) f32
    tp_rep         : (bs, H) f32
    profile_pooled : (bs * sent_num, H) f32  (flattened, like the torch input)
    weight         : (3H, C)  (stored transposed vs torch's (C, 3H))
    bias           : (C,)
    word_num       : unused (signature parity with the torch module)
    """
    H = context_rep.shape[1]
    C = weight.shape[1]

    # Lane-dense output: pad the class dim to a multiple of 128 (avoids vst.msk).
    C_pad = ((C + 127) // 128) * 128
    if C_pad != C:
        weight = jnp.pad(weight, ((0, 0), (0, C_pad - C)))
        bias = jnp.pad(bias, (0, C_pad - C))

    # bf16 weights: halve the dominant HBM DMA; accumulation stays f32 in-kernel.
    w = weight.astype(weight_dtype)
    b2d = bias.reshape(1, C_pad).astype(jnp.float32)

    # glue: the .view(bs, sent_num, -1) reshape stays in plain JAX
    prof = profile_pooled.reshape(bs, sent_num, H)

    # Tile over the class dim: largest 128-multiple tile that divides C_pad
    # (keeps 2 x 3H x TN weight buffering far under v7x's 64 MiB VMEM).
    if tn is None:
        tn = next(t for t in (512, 256, 128) if C_pad % t == 0)
    grid = (C_pad // tn,)

    kern = functools.partial(intention_classifier_kernel,
                             inv_sent_num=1.0 / float(sent_num))

    out = pl.pallas_call(
        kern,
        out_shape=jax.ShapeDtypeStruct((bs, C_pad), jnp.float32),
        grid=grid,
        in_specs=[
            pl.BlockSpec((bs, H), lambda j: (0, 0)),
            pl.BlockSpec((bs, H), lambda j: (0, 0)),
            pl.BlockSpec((bs, sent_num, H), lambda j: (0, 0, 0)),
            pl.BlockSpec((3 * H, tn), lambda j: (0, j)),
            pl.BlockSpec((1, tn), lambda j: (0, j)),
        ],
        out_specs=pl.BlockSpec((bs, tn), lambda j: (0, j)),
        compiler_params=pltpu.CompilerParams(
            dimension_semantics=("parallel",)),
    )(context_rep, tp_rep, prof, w, b2d)

    return out[:, :C] if C_pad != C else out


if __name__ == "__main__":
    # Small, TPU-friendly shapes consistent with the module's forward.
    bs = 8
    sent_num = 4
    word_num = 16          # unused by forward (signature parity only)
    H = 256                # "bert_embed_size" (small synthetic stand-in for 768)
    topic_class_num = 200  # deliberately NOT a multiple of 128 to exercise padding

    key = jax.random.PRNGKey(0)
    k1, k2, k3, k4, k5 = jax.random.split(key, 5)

    context_rep = jax.random.normal(k1, (bs, H), dtype=jnp.float32)
    tp_rep = jax.random.normal(k2, (bs, H), dtype=jnp.float32)
    profile_pooled = jax.random.normal(k3, (bs * sent_num, H), dtype=jnp.float32)

    # nn.Linear(3H, topic_class_num) params, deterministic init (stored transposed).
    lim = 1.0 / jnp.sqrt(3.0 * H)
    weight = jax.random.uniform(k4, (3 * H, topic_class_num),
                                minval=-lim, maxval=lim, dtype=jnp.float32)
    bias = jax.random.uniform(k5, (topic_class_num,),
                              minval=-lim, maxval=lim, dtype=jnp.float32)

    # Pure-JAX reference of the exact torch semantics (f32).
    prof_mean = profile_pooled.reshape(bs, sent_num, -1).mean(axis=1)
    state_rep = jnp.concatenate([context_rep, tp_rep, prof_mean], axis=1)
    ref = state_rep @ weight + bias

    # 1) Exact-precision path (f32 weights) — tight tolerance.
    out_f32 = intention_classifier(context_rep, tp_rep, profile_pooled,
                                   weight, bias, bs, sent_num, word_num,
                                   weight_dtype=jnp.float32)
    out_f32 = jax.block_until_ready(out_f32)
    assert out_f32.shape == (bs, topic_class_num)
    assert jnp.allclose(out_f32, ref, atol=1e-4, rtol=1e-4)

    # 2) Fast path (bf16 weights + bf16 MXU inputs, f32 accumulation).
    out_bf16 = intention_classifier(context_rep, tp_rep, profile_pooled,
                                    weight, bias, bs, sent_num, word_num,
                                    weight_dtype=jnp.bfloat16)
    out_bf16 = jax.block_until_ready(out_bf16)
    assert out_bf16.shape == (bs, topic_class_num)
    assert jnp.allclose(out_bf16, ref, atol=5e-2, rtol=5e-2)

    print("KERNEL_OK")
</pallas_src>

<mosaic_0001>
module attributes {stable_mosaic.version = 11 : i64} {
  func.func @intention_classifier_kernel(%arg0: i32, %arg1: memref<8x256xf32, #tpu.memory_space<vmem>>, %arg2: memref<8x256xf32, #tpu.memory_space<vmem>>, %arg3: memref<8x4x256xf32, #tpu.memory_space<vmem>>, %arg4: memref<768x256xf32, #tpu.memory_space<vmem>>, %arg5: memref<1x256xf32, #tpu.memory_space<vmem>>, %arg6: memref<8x256xf32, #tpu.memory_space<vmem>>) attributes {dimension_semantics = [#tpu.dimension_semantics<parallel>], iteration_bounds = array<i64: 1>, scalar_prefetch = 0 : i64, scratch_operands = 0 : i64, tpu.core_type = #tpu.core_type<tc>, window_params = [{pipeline_mode = #tpu.pipeline_mode<synchronous>, transform_indices = @transform_0, window_bounds = array<i64: 8, 256>}, {pipeline_mode = #tpu.pipeline_mode<synchronous>, transform_indices = @transform_1, window_bounds = array<i64: 8, 256>}, {pipeline_mode = #tpu.pipeline_mode<synchronous>, transform_indices = @transform_2, window_bounds = array<i64: 8, 4, 256>}, {transform_indices = @transform_3, window_bounds = array<i64: 768, 256>}, {transform_indices = @transform_4, window_bounds = array<i64: 1, 256>}, {transform_indices = @transform_5, window_bounds = array<i64: 8, 256>}]} {
    %c0 = arith.constant 0 : index
    %c0_0 = arith.constant 0 : index
    %c0_1 = arith.constant 0 : index
    %0 = vector.load %arg3[%c0, %c0_0, %c0_1] : memref<8x4x256xf32, #tpu.memory_space<vmem>>, vector<8x4x256xf32>
    %cst = arith.constant dense<0.000000e+00> : vector<8x256xf32>
    %1 = vector.multi_reduction <add>, %0, %cst [1] : vector<8x4x256xf32> to vector<8x256xf32>
    %c0_2 = arith.constant 0 : index
    %c0_3 = arith.constant 0 : index
    %2 = vector.load %arg1[%c0_2, %c0_3] : memref<8x256xf32, #tpu.memory_space<vmem>>, vector<8x256xf32>
    %c0_4 = arith.constant 0 : index
    %c0_5 = arith.constant 0 : index
    %3 = vector.load %arg4[%c0_4, %c0_5] : memref<768x256xf32, #tpu.memory_space<vmem>>, vector<256x256xf32>
    %cst_6 = arith.constant dense<0.000000e+00> : vector<8x256xf32>
    %4 = tpu.matmul %2, %3, %cst_6 {dimension_numbers = #tpu.dot_dimension_numbers<[1], [0], [0], [1], [0, 0, 1, 1], [], []>} : vector<8x256xf32>, vector<256x256xf32>, vector<8x256xf32> -> vector<8x256xf32>
    %c0_7 = arith.constant 0 : index
    %c0_8 = arith.constant 0 : index
    %5 = vector.load %arg2[%c0_7, %c0_8] : memref<8x256xf32, #tpu.memory_space<vmem>>, vector<8x256xf32>
    %c256 = arith.constant 256 : index
    %c0_9 = arith.constant 0 : index
    %6 = vector.load %arg4[%c256, %c0_9] : memref<768x256xf32, #tpu.memory_space<vmem>>, vector<256x256xf32>
    %cst_10 = arith.constant dense<0.000000e+00> : vector<8x256xf32>
    %7 = tpu.matmul %5, %6, %cst_10 {dimension_numbers = #tpu.dot_dimension_numbers<[1], [0], [0], [1], [0, 0, 1, 1], [], []>} : vector<8x256xf32>, vector<256x256xf32>, vector<8x256xf32> -> vector<8x256xf32>
    %8 = arith.addf %4, %7 : vector<8x256xf32>
    %c512 = arith.constant 512 : index
    %c0_11 = arith.constant 0 : index
    %9 = vector.load %arg4[%c512, %c0_11] : memref<768x256xf32, #tpu.memory_space<vmem>>, vector<256x256xf32>
    %cst_12 = arith.constant dense<0.000000e+00> : vector<8x256xf32>
    %10 = tpu.matmul %1, %9, %cst_12 {dimension_numbers = #tpu.dot_dimension_numbers<[1], [0], [0], [1], [0, 0, 1, 1], [], []>} : vector<8x256xf32>, vector<256x256xf32>, vector<8x256xf32> -> vector<8x256xf32>
    %cst_13 = arith.constant 2.500000e-01 : f32
    %11 = vector.broadcast %cst_13 : f32 to vector<8x256xf32>
    %12 = arith.mulf %11, %10 : vector<8x256xf32>
    %13 = arith.addf %8, %12 : vector<8x256xf32>
    %c0_14 = arith.constant 0 : index
    %c0_15 = arith.constant 0 : index
    %14 = vector.load %arg5[%c0_14, %c0_15] : memref<1x256xf32, #tpu.memory_space<vmem>>, vector<1x256xf32>
    %15 = vector.broadcast %14 : vector<1x256xf32> to vector<8x256xf32>
    %16 = arith.addf %13, %15 : vector<8x256xf32>
    %c0_16 = arith.constant 0 : index
    %c0_17 = arith.constant 0 : index
    %17 = vector.load %arg6[%c0_16, %c0_17] : memref<8x256xf32, #tpu.memory_space<vmem>>, vector<8x256xf32>
    tpu.vector_store %arg6[%c0_16, %c0_17], %16 {strides = array<i32>} : memref<8x256xf32, #tpu.memory_space<vmem>>, vector<8x256xf32>,
    return
  }
  func.func @transform_0(%arg0: i32) -> (i32, i32) {
    %c0_i32 = arith.constant 0 : i32
    %c0_i32_0 = arith.constant 0 : i32
    %c0_i32_1 = arith.constant 0 : i32
    return %c0_i32, %c0_i32_0 : i32, i32
  }
  func.func @transform_1(%arg0: i32) -> (i32, i32) {
    %c0_i32 = arith.constant 0 : i32
    %c0_i32_0 = arith.constant 0 : i32
    %c0_i32_1 = arith.constant 0 : i32
    return %c0_i32, %c0_i32_0 : i32, i32
  }
  func.func @transform_2(%arg0: i32) -> (i32, i32, i32) {
    %c0_i32 = arith.constant 0 : i32
    %c0_i32_0 = arith.constant 0 : i32
    %c0_i32_1 = arith.constant 0 : i32
    %c0_i32_2 = arith.constant 0 : i32
    return %c0_i32, %c0_i32_0, %c0_i32_1 : i32, i32, i32
  }
  func.func @transform_3(%arg0: i32) -> (i32, i32) {
    %c0_i32 = arith.constant 0 : i32
    %c0_i32_0 = arith.constant 0 : i32
    return %c0_i32, %arg0 : i32, i32
  }
  func.func @transform_4(%arg0: i32) -> (i32, i32) {
    %c0_i32 = arith.constant 0 : i32
    %c0_i32_0 = arith.constant 0 : i32
    return %c0_i32, %arg0 : i32, i32
  }
  func.func @transform_5(%arg0: i32) -> (i32, i32) {
    %c0_i32 = arith.constant 0 : i32
    %c0_i32_0 = arith.constant 0 : i32
    return %c0_i32, %arg0 : i32, i32
  }
}

</mosaic_0001>

<bundles_post_ra>
// kernel: tpu_custom_call.1
= control target key start
LH: loop header
LB: loop body
LE: loop exit
PB: predicated region body
PF: predicated region fallthrough
CT: control target
= control target key end

     0   :  { %10 = vsyncpa [#allocation3], 0  ;;  %s954_s0 = inlined_call_operand.hbm [shape: f32[8,256], index: 0, kind: input, shape index: {}]   ;;  %s955_s1 = inlined_call_operand.hbm [shape: f32[8,256], index: 1, kind: input, shape index: {}]   ;;  %s956_s2 = inlined_call_operand.hbm [shape: f32[8,4,256], index: 2, kind: input, shape index: {}]   ;;  %s957_s3 = inlined_call_operand.hbm [shape: f32[768,256], index: 3, kind: input, shape index: {}]   ;;  %s958_s4 = inlined_call_operand.vmem [shape: f32[1,256], index: 4, kind: input, shape index: {}]   ;;  %s959_s5 = inlined_call_operand.hbm [shape: f32[8,256], index: 5, kind: output, shape index: {}]  }
   0x1   :  { %11 = vsyncpa [#allocation6], 0 }
   0x2   :  { %12 = vsyncpa [#allocation9], 0 }
   0x3   :  { %13 = vsyncpa [#allocation4], 0  ;;  %s827_s18 = smov [#allocation5]   ;;  %s828_s20 = smov [#allocation2]  }
   0x4   :  { %s30_s19 = sshll.u32 %s827_s18, 4  ;;  %s20_s21 = sshll.u32 %s828_s20, 4  ;;  %s31_s19 = int_to_ptr.vmem [resolvable:$true] %s30_s19  ;;  %s21_s21 = int_to_ptr.vmem [resolvable:$true] %s20_s21 }
   0x5   :  { %s727_s22 = scalar_lea.vmem %s31_s19, 256  ;;  %p732_p1 = scmp.lt.s32.totalorder %s31_s19, %s31_s19 }
   0x6   :  { %p728_p0 = scmp.ne.s32.totalorder %s31_s19, %s727_s22  ;;  %p733_p2 = scmp.lt.s32.totalorder %s727_s22, %s727_s22 }
   0x8   :  { %p734_p3 = por %p733_p2, %p732_p1 }
   0xa   :  { %p735_p4 = pnand %p734_p3, %p728_p0 }
   0xc   :  { %738 = shalt.err (!%p735_p4)
}
   0xd   :  { %33 = dma.hbm_to_vmem [thread:$0]  %s955_s1, 256, %s31_s19, [#allocation6]  }
   0xe   :  { %s747_s25 = scalar_lea.vmem %s21_s21, 256  ;;  %p752_p6 = scmp.lt.s32.totalorder %s21_s21, %s21_s21 }
   0xf   :  { %p748_p5 = scmp.ne.s32.totalorder %s21_s21, %s747_s25  ;;  %p753_p7 = scmp.lt.s32.totalorder %s747_s25, %s747_s25 }
  0x11   :  { %p754_p8 = por %p753_p7, %p752_p6 }
  0x13   :  { %p755_p9 = pnand %p754_p8, %p748_p5 }
  0x15   :  { %758 = shalt.err (!%p755_p9)
}
  0x16   :  { %23 = dma.hbm_to_vmem [thread:$0]  %s954_s0, 256, %s21_s21, [#allocation3]  }
  0x17   :  { %s829_s28 = smov [#allocation7]  }
  0x18   :  { %s39_s29 = sshll.u32 %s829_s28, 4  ;;  %s40_s29 = int_to_ptr.vmem [resolvable:$true] %s39_s29 }
  0x19   :  { %s767_s30 = scalar_lea.vmem %s40_s29, 1024  ;;  %p772_p11 = scmp.lt.s32.totalorder %s40_s29, %s40_s29 }
  0x1a   :  { %p768_p10 = scmp.ne.s32.totalorder %s40_s29, %s767_s30  ;;  %p773_p12 = scmp.lt.s32.totalorder %s767_s30, %s767_s30 }
  0x1c   :  { %p774_p13 = por %p773_p12, %p772_p11 }
  0x1e   :  { %p775_p0 = pnand %p774_p13, %p768_p10 }
  0x20   :  { %778 = shalt.err (!%p775_p0)
}
  0x21   :  { %s830_s1 = smov 128   ;;  %s831_s6 = smov 8  }
  0x22   :  { %45 = dma.hbm_to_vmem [thread:$0]  %s956_s2, 1024, %s40_s29, [#allocation6], %s830_s1, %s830_s1, %s831_s6  }
  0x23   :  { %s832_s9 = smov [#allocation8]  }
  0x24   :  { %s51_s10 = sshll.u32 %s832_s9, 4  ;;  %s52_s10 = int_to_ptr.vmem [resolvable:$true] %s51_s10 }
  0x25   :  { %s787_s0 = scalar_lea.vmem %s52_s10, 24576  ;;  %p792_p2 = scmp.lt.s32.totalorder %s52_s10, %s52_s10 }
  0x26   :  { %p788_p1 = scmp.ne.s32.totalorder %s52_s10, %s787_s0  ;;  %p793_p3 = scmp.lt.s32.totalorder %s787_s0, %s787_s0 }
  0x28   :  { %p794_p4 = por %p793_p3, %p792_p2 }
  0x2a   :  { %p795_p5 = pnand %p794_p4, %p788_p1 }
  0x2c   :  { %798 = shalt.err (!%p795_p5)
}
  0x2d   :  { %s833_s11 = smov 256   ;;  %s834_s12 = smov 16  }
  0x2e   :  { %57 = dma.hbm_to_vmem [thread:$0]  %s957_s3, 24576, %s52_s10, [#allocation9], %s833_s11, %s833_s11, %s834_s12  }
  0x2f   :  { %819 = dma.done.wait [#allocation3], 256  }
  0x30   :  { %820 = vsyncadd [#allocation3], 4294967040 }
  0x31   :  { %821 = dma.done.wait [#allocation6], 1280  }
  0x32   :  { %822 = vsyncadd [#allocation6], 4294966016 }
  0x33   :  { %823 = dma.done.wait [#allocation9], 24576  }
  0x34   :  { %824 = vsyncadd [#allocation9], 4294942720  ;;  %v316_v0 = vld [vmem:[#allocation8 + $0x2f8] sm:$0xff]  ;;  %v315_v2 = vld [vmem:[#allocation8 + $0x2f0] sm:$0xff]  ;;  %vm104_vm0 = vcmask 1043456   ;;  %vm571_vm1 = vcmask 1041409  }
  0x35   :  { %v250_v1 = vld [vmem:[#allocation8 + $0xf8] sm:$0xff]  ;;  %349 = vmatprep.subr.mxu0 %v316_v0  ;;  %v249_v3 = vld [vmem:[#allocation8 + $0xf0] sm:$0xff]  ;;  %v314_v4 = vld [vmem:[#allocation8 + $0x2e8] sm:$0xff]  ;;  %vm573_vm2 = vcmask 1042434   ;;  %vm575_vm3 = vcmask 1043459   ;;  %vm577_vm4 = vcmask 1044484  }
  0x36   :  { %420 = vmatprep.subr.mxu1 %v250_v1  ;;  %v248_v5 = vld [vmem:[#allocation8 + $0xe8] sm:$0xff]  ;;  %350 = vmatpush1.msra.mxu0 %v315_v2  ;;  %v313_v6 = vld [vmem:[#allocation8 + $0x2e0] sm:$0xff]  ;;  %v312_v8 = vld [vmem:[#allocation8 + $0x2d8] sm:$0xff]  ;;  %vm579_vm5 = vcmask 1045509   ;;  %vm581_vm6 = vcmask 1046534   ;;  %vm583_vm7 = vcmask 1047559  }
  0x37   :  { %421 = vmatpush1.msra.mxu1 %v249_v3  ;;  %v247_v7 = vld [vmem:[#allocation8 + $0xe0] sm:$0xff]  ;;  %351 = vmatprep.subr.mxu0 %v314_v4  ;;  %v246_v9 = vld [vmem:[#allocation8 + $0xd8] sm:$0xff]  ;;  %v311_v10 = vld [vmem:[#allocation8 + $0x2d0] sm:$0xff]  ;;  %s835_s15 = smov [#allocation10]  }
  0x38   :  { %422 = vmatprep.subr.mxu1 %v248_v5  ;;  %v245_v11 = vld [vmem:[#allocation8 + $0xd0] sm:$0xff]  ;;  %352 = vmatpush1.msra.mxu0 %v313_v6  ;;  %v310_v12 = vld [vmem:[#allocation8 + $0x2c8] sm:$0xff]  ;;  %v309_v14 = vld [vmem:[#allocation8 + $0x2c0] sm:$0xff]  ;;  %s691_s16 = sshll.u32 %s835_s15, 4  ;;  %s692_s16 = int_to_ptr.vmem [resolvable:$true] %s691_s16 }
  0x39   :  { %423 = vmatpush1.msra.mxu1 %v247_v7  ;;  %v244_v13 = vld [vmem:[#allocation8 + $0xc8] sm:$0xff]  ;;  %353 = vmatprep.subr.mxu0 %v312_v8  ;;  %v243_v15 = vld [vmem:[#allocation8 + $0xc0] sm:$0xff]  ;;  %v308_v16 = vld [vmem:[#allocation8 + $0x2b8] sm:$0xff]  ;;  %p804_p7 = scmp.lt.s32.totalorder %s692_s16, %s692_s16 }
  0x3a   :  { %424 = vmatprep.subr.mxu1 %v246_v9  ;;  %354 = vmatpush1.msra.mxu0 %v311_v10  ;;  %v242_v17 = vld [vmem:[#allocation8 + $0xb8] sm:$0xff]  ;;  %v307_v18 = vld [vmem:[#allocation8 + $0x2b0] sm:$0xff]  ;;  %v306_v20 = vld [vmem:[#allocation8 + $0x2a8] sm:$0xff] }
  0x3b   :  { %425 = vmatpush1.msra.mxu1 %v245_v11  ;;  %355 = vmatprep.subr.mxu0 %v310_v12  ;;  %v241_v19 = vld [vmem:[#allocation8 + $0xb0] sm:$0xff]  ;;  %v240_v21 = vld [vmem:[#allocation8 + $0xa8] sm:$0xff]  ;;  %v305_v22 = vld [vmem:[#allocation8 + $0x2a0] sm:$0xff] }
  0x3c   :  { %426 = vmatprep.subr.mxu1 %v244_v13  ;;  %356 = vmatpush1.msra.mxu0 %v309_v14  ;;  %v239_v23 = vld [vmem:[#allocation8 + $0xa0] sm:$0xff]  ;;  %v304_v24 = vld [vmem:[#allocation8 + $0x298] sm:$0xff]  ;;  %v303_v26 = vld [vmem:[#allocation8 + $0x290] sm:$0xff] }
  0x3d   :  { %427 = vmatpush1.msra.mxu1 %v243_v15  ;;  %357 = vmatprep.subr.mxu0 %v308_v16  ;;  %v238_v25 = vld [vmem:[#allocation8 + $0x98] sm:$0xff]  ;;  %v237_v27 = vld [vmem:[#allocation8 + $0x90] sm:$0xff]  ;;  %v302_v28 = vld [vmem:[#allocation8 + $0x288] sm:$0xff] }
  0x3e   :  { %428 = vmatprep.subr.mxu1 %v242_v17  ;;  %358 = vmatpush1.msra.mxu0 %v307_v18  ;;  %v236_v29 = vld [vmem:[#allocation8 + $0x88] sm:$0xff]  ;;  %v301_v30 = vld [vmem:[#allocation8 + $0x280] sm:$0xff]  ;;  %v300_v32 = vld [vmem:[#allocation8 + $0x278] sm:$0xff] }
  0x3f   :  { %429 = vmatpush1.msra.mxu1 %v241_v19  ;;  %359 = vmatprep.subr.mxu0 %v306_v20  ;;  %v235_v31 = vld [vmem:[#allocation8 + $0x80] sm:$0xff]  ;;  %v234_v33 = vld [vmem:[#allocation8 + $0x78] sm:$0xff]  ;;  %v299_v34 = vld [vmem:[#allocation8 + $0x270] sm:$0xff] }
  0x40   :  { %430 = vmatprep.subr.mxu1 %v240_v21  ;;  %360 = vmatpush1.msra.mxu0 %v305_v22  ;;  %v233_v35 = vld [vmem:[#allocation8 + $0x70] sm:$0xff]  ;;  %v298_v36 = vld [vmem:[#allocation8 + $0x268] sm:$0xff]  ;;  %v297_v38 = vld [vmem:[#allocation8 + $0x260] sm:$0xff] }
  0x41   :  { %431 = vmatpush1.msra.mxu1 %v239_v23  ;;  %361 = vmatprep.subr.mxu0 %v304_v24  ;;  %v232_v37 = vld [vmem:[#allocation8 + $0x68] sm:$0xff]  ;;  %v231_v39 = vld [vmem:[#allocation8 + $0x60] sm:$0xff]  ;;  %v296_v40 = vld [vmem:[#allocation8 + $0x258] sm:$0xff] }
  0x42   :  { %432 = vmatprep.subr.mxu1 %v238_v25  ;;  %362 = vmatpush1.msra.mxu0 %v303_v26  ;;  %v230_v41 = vld [vmem:[#allocation8 + $0x58] sm:$0xff]  ;;  %v295_v42 = vld [vmem:[#allocation8 + $0x250] sm:$0xff]  ;;  %v294_v44 = vld [vmem:[#allocation8 + $0x248] sm:$0xff] }
  0x43   :  { %433 = vmatpush1.msra.mxu1 %v237_v27  ;;  %363 = vmatprep.subr.mxu0 %v302_v28  ;;  %v229_v43 = vld [vmem:[#allocation8 + $0x50] sm:$0xff]  ;;  %v228_v45 = vld [vmem:[#allocation8 + $0x48] sm:$0xff]  ;;  %v293_v46 = vld [vmem:[#allocation8 + $0x240] sm:$0xff] }
  0x44   :  { %434 = vmatprep.subr.mxu1 %v236_v29  ;;  %364 = vmatpush1.msra.mxu0 %v301_v30  ;;  %v227_v47 = vld [vmem:[#allocation8 + $0x40] sm:$0xff]  ;;  %v292_v48 = vld [vmem:[#allocation8 + $0x238] sm:$0xff]  ;;  %v291_v50 = vld [vmem:[#allocation8 + $0x230] sm:$0xff] }
  0x45   :  { %435 = vmatpush1.msra.mxu1 %v235_v31  ;;  %365 = vmatprep.subr.mxu0 %v300_v32  ;;  %v226_v49 = vld [vmem:[#allocation8 + $0x38] sm:$0xff]  ;;  %v225_v51 = vld [vmem:[#allocation8 + $0x30] sm:$0xff]  ;;  %v290_v52 = vld [vmem:[#allocation8 + $0x228] sm:$0xff] }
  0x46   :  { %436 = vmatprep.subr.mxu1 %v234_v33  ;;  %366 = vmatpush1.msra.mxu0 %v299_v34  ;;  %v224_v53 = vld [vmem:[#allocation8 + $0x28] sm:$0xff]  ;;  %v289_v54 = vld [vmem:[#allocation8 + $0x220] sm:$0xff]  ;;  %v288_v56 = vld [vmem:[#allocation8 + $0x218] sm:$0xff] }
  0x47   :  { %437 = vmatpush1.msra.mxu1 %v233_v35  ;;  %367 = vmatprep.subr.mxu0 %v298_v36  ;;  %v223_v55 = vld [vmem:[#allocation8 + $0x20] sm:$0xff]  ;;  %v222_v57 = vld [vmem:[#allocation8 + $0x18] sm:$0xff]  ;;  %v287_v58 = vld [vmem:[#allocation8 + $0x210] sm:$0xff] }
  0x48   :  { %438 = vmatprep.subr.mxu1 %v232_v37  ;;  %368 = vmatpush1.msra.mxu0 %v297_v38  ;;  %v221_v59 = vld [vmem:[#allocation8 + $0x10] sm:$0xff]  ;;  %v286_v60 = vld [vmem:[#allocation8 + $0x208] sm:$0xff]  ;;  %v285_v62 = vld [vmem:[#allocation8 + $0x200] sm:$0xff] }
  0x49   :  { %439 = vmatpush1.msra.mxu1 %v231_v39  ;;  %369 = vmatprep.subr.mxu0 %v296_v40  ;;  %v220_v61 = vld [vmem:[#allocation8 + $0x8] sm:$0xff]  ;;  %v219_v63 = vld [vmem:[#allocation8] sm:$0xff]  ;;  %v348_v0 = vld [vmem:[#allocation8 + $0x3f8] sm:$0xff] }
  0x4a   :  { %440 = vmatprep.subr.mxu1 %v230_v41  ;;  %370 = vmatpush1.msra.mxu0 %v295_v42  ;;  %v282_v1 = vld [vmem:[#allocation8 + $0x1f8] sm:$0xff]  ;;  %v347_v2 = vld [vmem:[#allocation8 + $0x3f0] sm:$0xff]  ;;  %v346_v4 = vld [vmem:[#allocation8 + $0x3e8] sm:$0xff] }
  0x4b   :  { %441 = vmatpush1.msra.mxu1 %v229_v43  ;;  %371 = vmatprep.subr.mxu0 %v294_v44  ;;  %v281_v3 = vld [vmem:[#allocation8 + $0x1f0] sm:$0xff]  ;;  %v280_v5 = vld [vmem:[#allocation8 + $0x1e8] sm:$0xff]  ;;  %v345_v6 = vld [vmem:[#allocation8 + $0x3e0] sm:$0xff] }
  0x4c   :  { %442 = vmatprep.subr.mxu1 %v228_v45  ;;  %372 = vmatpush1.msra.mxu0 %v293_v46  ;;  %v279_v7 = vld [vmem:[#allocation8 + $0x1e0] sm:$0xff]  ;;  %v344_v8 = vld [vmem:[#allocation8 + $0x3d8] sm:$0xff]  ;;  %v343_v10 = vld [vmem:[#allocation8 + $0x3d0] sm:$0xff] }
  0x4d   :  { %443 = vmatpush1.msra.mxu1 %v227_v47  ;;  %373 = vmatprep.subr.mxu0 %v292_v48  ;;  %v278_v9 = vld [vmem:[#allocation8 + $0x1d8] sm:$0xff]  ;;  %v277_v11 = vld [vmem:[#allocation8 + $0x1d0] sm:$0xff]  ;;  %v342_v12 = vld [vmem:[#allocation8 + $0x3c8] sm:$0xff] }
  0x4e   :  { %444 = vmatprep.subr.mxu1 %v226_v49  ;;  %374 = vmatpush1.msra.mxu0 %v291_v50  ;;  %v276_v13 = vld [vmem:[#allocation8 + $0x1c8] sm:$0xff]  ;;  %v341_v14 = vld [vmem:[#allocation8 + $0x3c0] sm:$0xff]  ;;  %v340_v16 = vld [vmem:[#allocation8 + $0x3b8] sm:$0xff] }
  0x4f   :  { %445 = vmatpush1.msra.mxu1 %v225_v51  ;;  %375 = vmatprep.subr.mxu0 %v290_v52  ;;  %v275_v15 = vld [vmem:[#allocation8 + $0x1c0] sm:$0xff]  ;;  %v274_v17 = vld [vmem:[#allocation8 + $0x1b8] sm:$0xff]  ;;  %v339_v18 = vld [vmem:[#allocation8 + $0x3b0] sm:$0xff] }
  0x50   :  { %446 = vmatprep.subr.mxu1 %v224_v53  ;;  %376 = vmatpush1.msra.mxu0 %v289_v54  ;;  %v273_v19 = vld [vmem:[#allocation8 + $0x1b0] sm:$0xff]  ;;  %v338_v20 = vld [vmem:[#allocation8 + $0x3a8] sm:$0xff]  ;;  %v337_v22 = vld [vmem:[#allocation8 + $0x3a0] sm:$0xff] }
  0x51   :  { %447 = vmatpush1.msra.mxu1 %v223_v55  ;;  %377 = vmatprep.subr.mxu0 %v288_v56  ;;  %v272_v21 = vld [vmem:[#allocation8 + $0x1a8] sm:$0xff]  ;;  %v271_v23 = vld [vmem:[#allocation8 + $0x1a0] sm:$0xff]  ;;  %v336_v24 = vld [vmem:[#allocation8 + $0x398] sm:$0xff] }
  0x52   :  { %448 = vmatprep.subr.mxu1 %v222_v57  ;;  %378 = vmatpush1.msra.mxu0 %v287_v58  ;;  %v270_v25 = vld [vmem:[#allocation8 + $0x198] sm:$0xff]  ;;  %v335_v26 = vld [vmem:[#allocation8 + $0x390] sm:$0xff]  ;;  %v334_v28 = vld [vmem:[#allocation8 + $0x388] sm:$0xff] }
  0x53   :  { %449 = vmatpush1.msra.mxu1 %v221_v59  ;;  %379 = vmatprep.subr.mxu0 %v286_v60  ;;  %v269_v27 = vld [vmem:[#allocation8 + $0x190] sm:$0xff]  ;;  %v268_v29 = vld [vmem:[#allocation8 + $0x188] sm:$0xff]  ;;  %v333_v30 = vld [vmem:[#allocation8 + $0x380] sm:$0xff] }
  0x54   :  { %450 = vmatprep.subr.mxu1 %v220_v61  ;;  %380 = vmatpush1.msra.mxu0 %v285_v62  ;;  %v267_v31 = vld [vmem:[#allocation8 + $0x180] sm:$0xff]  ;;  %v332_v32 = vld [vmem:[#allocation8 + $0x378] sm:$0xff]  ;;  %v331_v34 = vld [vmem:[#allocation8 + $0x370] sm:$0xff] }
  0x55   :  { %451 = vmatpush1.msra.mxu1 %v219_v63  ;;  %381 = vmatprep.subr.mxu0 %v348_v0  ;;  %v266_v33 = vld [vmem:[#allocation8 + $0x178] sm:$0xff]  ;;  %v265_v35 = vld [vmem:[#allocation8 + $0x170] sm:$0xff]  ;;  %v330_v36 = vld [vmem:[#allocation8 + $0x368] sm:$0xff] }
  0x56   :  { %452 = vmatprep.subr.mxu1 %v282_v1  ;;  %382 = vmatpush2.msra.mxu0 %v347_v2  ;;  %v264_v37 = vld [vmem:[#allocation8 + $0x168] sm:$0xff]  ;;  %v329_v38 = vld [vmem:[#allocation8 + $0x360] sm:$0xff]  ;;  %v328_v40 = vld [vmem:[#allocation8 + $0x358] sm:$0xff] }
  0x57   :  { %453 = vmatpush2.msra.mxu1 %v281_v3  ;;  %383 = vmatprep.subr.mxu0 %v346_v4  ;;  %v263_v39 = vld [vmem:[#allocation8 + $0x160] sm:$0xff]  ;;  %v262_v41 = vld [vmem:[#allocation8 + $0x158] sm:$0xff]  ;;  %v327_v42 = vld [vmem:[#allocation8 + $0x350] sm:$0xff] }
  0x58   :  { %454 = vmatprep.subr.mxu1 %v280_v5  ;;  %384 = vmatpush2.msra.mxu0 %v345_v6  ;;  %v261_v43 = vld [vmem:[#allocation8 + $0x150] sm:$0xff]  ;;  %v326_v44 = vld [vmem:[#allocation8 + $0x348] sm:$0xff]  ;;  %v325_v46 = vld [vmem:[#allocation8 + $0x340] sm:$0xff] }
  0x59   :  { %455 = vmatpush2.msra.mxu1 %v279_v7  ;;  %385 = vmatprep.subr.mxu0 %v344_v8  ;;  %v260_v45 = vld [vmem:[#allocation8 + $0x148] sm:$0xff]  ;;  %v259_v47 = vld [vmem:[#allocation8 + $0x140] sm:$0xff]  ;;  %v324_v48 = vld [vmem:[#allocation8 + $0x338] sm:$0xff] }
  0x5a   :  { %456 = vmatprep.subr.mxu1 %v278_v9  ;;  %386 = vmatpush2.msra.mxu0 %v343_v10  ;;  %v258_v49 = vld [vmem:[#allocation8 + $0x138] sm:$0xff]  ;;  %v323_v50 = vld [vmem:[#allocation8 + $0x330] sm:$0xff]  ;;  %v322_v52 = vld [vmem:[#allocation8 + $0x328] sm:$0xff] }
  0x5b   :  { %457 = vmatpush2.msra.mxu1 %v277_v11  ;;  %387 = vmatprep.subr.mxu0 %v342_v12  ;;  %v257_v51 = vld [vmem:[#allocation8 + $0x130] sm:$0xff]  ;;  %v256_v53 = vld [vmem:[#allocation8 + $0x128] sm:$0xff]  ;;  %v321_v54 = vld [vmem:[#allocation8 + $0x320] sm:$0xff] }
  0x5c   :  { %458 = vmatprep.subr.mxu1 %v276_v13  ;;  %388 = vmatpush2.msra.mxu0 %v341_v14  ;;  %v255_v55 = vld [vmem:[#allocation8 + $0x120] sm:$0xff]  ;;  %v320_v56 = vld [vmem:[#allocation8 + $0x318] sm:$0xff]  ;;  %v319_v58 = vld [vmem:[#allocation8 + $0x310] sm:$0xff] }
  0x5d   :  { %459 = vmatpush2.msra.mxu1 %v275_v15  ;;  %389 = vmatprep.subr.mxu0 %v340_v16  ;;  %v254_v57 = vld [vmem:[#allocation8 + $0x118] sm:$0xff]  ;;  %v253_v59 = vld [vmem:[#allocation8 + $0x110] sm:$0xff]  ;;  %v318_v60 = vld [vmem:[#allocation8 + $0x308] sm:$0xff] }
  0x5e   :  { %460 = vmatprep.subr.mxu1 %v274_v17  ;;  %390 = vmatpush2.msra.mxu0 %v339_v18  ;;  %v252_v61 = vld [vmem:[#allocation8 + $0x108] sm:$0xff]  ;;  %v317_v62 = vld [vmem:[#allocation8 + $0x300] sm:$0xff]  ;;  %v284_v63 = vld [vmem:[#allocation5 + $0x8] sm:$0xff] }
  0x5f   :  { %461 = vmatpush2.msra.mxu1 %v273_v19  ;;  %391 = vmatprep.subr.mxu0 %v338_v20  ;;  %v251_v0 = vld [vmem:[#allocation8 + $0x100] sm:$0xff]  ;;  %v218_v1 = vld [vmem:[#allocation2 + $0x8] sm:$0xff]  ;;  %v283_v2 = vld [vmem:[#allocation5] sm:$0xff] }
  0x60   :  { %462 = vmatprep.subr.mxu1 %v272_v21  ;;  %392 = vmatpush2.msra.mxu0 %v337_v22  ;;  %v217_v3 = vld [vmem:[#allocation2] sm:$0xff]  ;;  %v522_v4 = vld [vmem:[#allocation8 + $0x4f8] sm:$0xff]  ;;  %v521_v5 = vld [vmem:[#allocation8 + $0x4f0] sm:$0xff] }
  0x61   :  { %463 = vmatpush2.msra.mxu1 %v271_v23  ;;  %393 = vmatprep.subr.mxu0 %v336_v24  ;;  %v520_v6 = vld [vmem:[#allocation8 + $0x4e8] sm:$0xff]  ;;  %v519_v7 = vld [vmem:[#allocation8 + $0x4e0] sm:$0xff]  ;;  %v882_v10 = vld [vmem:[#allocation7 + $0x10] sm:$0xff] }
  0x62   :  { %464 = vmatprep.subr.mxu1 %v270_v25  ;;  %394 = vmatpush2.msra.mxu0 %v335_v26  ;;  %v878_v8 = vld [vmem:[#allocation7] sm:$0xff]  ;;  %v880_v9 = vld [vmem:[#allocation7 + $0x8] sm:$0xff]  ;;  %v884_v11 = vld [vmem:[#allocation7 + $0x18] sm:$0xff]  ;;  %v90_v18 = vcombine.high %v882_v10, %v882_v10 }
  0x63   :  { %465 = vmatpush2.msra.mxu1 %v269_v27  ;;  %395 = vmatprep.subr.mxu0 %v334_v28  ;;  %v886_v12 = vld [vmem:[#allocation7 + $0x20] sm:$0xff]  ;;  %v88_v13 = vcombine.high %v878_v8, %v878_v8  ;;  %v89_v14 = vcombine.high %v880_v9, %v880_v9  ;;  %v892_v15 = vld [vmem:[#allocation7 + $0x28] sm:$0xff]  ;;  %v894_v16 = vld [vmem:[#allocation7 + $0x30] sm:$0xff]  ;;  %v91_v19 = vcombine.high %v884_v11, %v884_v11 }
  0x64   :  { %466 = vmatprep.subr.mxu1 %v268_v29  ;;  %396 = vmatpush2.msra.mxu0 %v333_v30  ;;  %v896_v17 = vld [vmem:[#allocation7 + $0x38] sm:$0xff]  ;;  %v92_v20 = vcombine.high %v886_v12, %v886_v12  ;;  %v93_v22 = vcombine.high %v892_v15, %v892_v15  ;;  %v94_v23 = vcombine.high %v894_v16, %v894_v16  ;;  %v517_v26 = vld [vmem:[#allocation8 + $0x4d0] sm:$0xff]  ;;  %v140_v29 = vsel %vm104_vm0, %v90_v18, 0.0 }
  0x65   :  { %467 = vmatpush2.msra.mxu1 %v267_v31  ;;  %397 = vmatprep.subr.mxu0 %v332_v32  ;;  %v518_v21 = vld [vmem:[#allocation8 + $0x4d8] sm:$0xff]  ;;  %v95_v24 = vcombine.high %v896_v17, %v896_v17  ;;  %v112_v25 = vsel %vm104_vm0, %v88_v13, 0.0  ;;  %v126_v28 = vsel %vm104_vm0, %v89_v14, 0.0  ;;  %v154_v30 = vsel %vm104_vm0, %v91_v19, 0.0  ;;  %v516_v31 = vld [vmem:[#allocation8 + $0x4c8] sm:$0xff] }
  0x66   :  { %468 = vmatprep.subr.mxu1 %v266_v33  ;;  %398 = vmatpush2.msra.mxu0 %v331_v34  ;;  %v113_v27 = vrot.slane %v112_v25, 4  ;;  %v127_v32 = vrot.slane %v126_v28, 4  ;;  %v141_v33 = vrot.slane %v140_v29, 4  ;;  %v155_v34 = vrot.slane %v154_v30, 4 }
  0x67   :  { %469 = vmatpush2.msra.mxu1 %v265_v35  ;;  %399 = vmatprep.subr.mxu0 %v330_v36  ;;  %v168_v35 = vsel %vm104_vm0, %v92_v20, 0.0  ;;  %v515_v36 = vld [vmem:[#allocation8 + $0x4c0] sm:$0xff] }
  0x68   :  { %470 = vmatprep.subr.mxu1 %v264_v37  ;;  %400 = vmatpush2.msra.mxu0 %v329_v38  ;;  %v114_v37 = vadd.f32 %v113_v27, %v112_v25  ;;  %v169_v38 = vrot.slane %v168_v35, 4  ;;  %v507_v20 = vld [vmem:[#allocation8 + $0x480] sm:$0xff]  ;;  %v506_v25 = vld [vmem:[#allocation8 + $0x478] sm:$0xff] }
  0x69   :  { %471 = vmatpush2.msra.mxu1 %v263_v39  ;;  %401 = vmatprep.subr.mxu0 %v328_v40  ;;  %v182_v39 = vsel %vm104_vm0, %v93_v22, 0.0  ;;  %v196_v40 = vsel %vm104_vm0, %v94_v23, 0.0 }
  0x6a   :  { %472 = vmatprep.subr.mxu1 %v262_v41  ;;  %402 = vmatpush2.msra.mxu0 %v327_v42  ;;  %v514_v41 = vld [vmem:[#allocation8 + $0x4b8] sm:$0xff]  ;;  %v128_v42 = vadd.f32 %v127_v32, %v126_v28 }
  0x6b   :  { %473 = vmatpush2.msra.mxu1 %v261_v43  ;;  %403 = vmatprep.subr.mxu0 %v326_v44  ;;  %v142_v43 = vadd.f32 %v141_v33, %v140_v29  ;;  %v156_v44 = vadd.f32 %v155_v34, %v154_v30  ;;  %v505_v30 = vld [vmem:[#allocation8 + $0x470] sm:$0xff]  ;;  %v504_v34 = vld [vmem:[#allocation8 + $0x468] sm:$0xff] }
  0x6c   :  { %474 = vmatprep.subr.mxu1 %v260_v45  ;;  %404 = vmatpush2.msra.mxu0 %v325_v46  ;;  %v183_v45 = vrot.slane %v182_v39, 4  ;;  %v513_v46 = vld [vmem:[#allocation8 + $0x4b0] sm:$0xff] }
  0x6d   :  { %475 = vmatpush2.msra.mxu1 %v259_v47  ;;  %405 = vmatprep.subr.mxu0 %v324_v48  ;;  %v115_v47 = vrot.slane %v114_v37, 2  ;;  %v170_v48 = vadd.f32 %v169_v38, %v168_v35  ;;  %v503_v38 = vld [vmem:[#allocation8 + $0x460] sm:$0xff] }
  0x6e   :  { %476 = vmatprep.subr.mxu1 %v258_v49  ;;  %406 = vmatpush2.msra.mxu0 %v323_v50  ;;  %v197_v49 = vrot.slane %v196_v40, 4  ;;  %v210_v50 = vsel %vm104_vm0, %v95_v24, 0.0 }
  0x6f   :  { %477 = vmatpush2.msra.mxu1 %v257_v51  ;;  %407 = vmatprep.subr.mxu0 %v322_v52  ;;  %v512_v51 = vld [vmem:[#allocation8 + $0x4a8] sm:$0xff]  ;;  %v129_v52 = vrot.slane %v128_v42, 2 }
  0x70   :  { %478 = vmatprep.subr.mxu1 %v256_v53  ;;  %408 = vmatpush2.msra.mxu0 %v321_v54  ;;  %v143_v53 = vrot.slane %v142_v43, 2  ;;  %v157_v54 = vrot.slane %v156_v44, 2 }
  0x71   :  { %479 = vmatpush2.msra.mxu1 %v255_v55  ;;  %409 = vmatprep.subr.mxu0 %v320_v56  ;;  %v184_v55 = vadd.f32 %v183_v45, %v182_v39  ;;  %v511_v56 = vld [vmem:[#allocation8 + $0x4a0] sm:$0xff]  ;;  %v501_v45 = vld [vmem:[#allocation8 + $0x450] sm:$0xff] }
  0x72   :  { %480 = vmatprep.subr.mxu1 %v254_v57  ;;  %410 = vmatpush2.msra.mxu0 %v319_v58  ;;  %v116_v57 = vadd.f32 %v115_v47, %v114_v37  ;;  %v171_v58 = vrot.slane %v170_v48, 2  ;;  %v105_v37 = vsel %vm104_vm0, %v878_v8, 0.0  ;;  %v500_v47 = vld [vmem:[#allocation8 + $0x448] sm:$0xff] }
  0x73   :  { %481 = vmatpush2.msra.mxu1 %v253_v59  ;;  %411 = vmatprep.subr.mxu0 %v318_v60  ;;  %v198_v59 = vadd.f32 %v197_v49, %v196_v40  ;;  %v211_v60 = vrot.slane %v210_v50, 4  ;;  %v106_v49 = vrot.slane %v105_v37, 4 }
  0x74   :  { %482 = vmatprep.subr.mxu1 %v252_v61  ;;  %412 = vmatpush2.msra.mxu0 %v317_v62  ;;  %v510_v61 = vld [vmem:[#allocation8 + $0x498] sm:$0xff]  ;;  %v130_v62 = vadd.f32 %v129_v52, %v128_v42  ;;  %v119_v42 = vsel %vm104_vm0, %v880_v9, 0.0  ;;  %v133_v9 = vsel %vm104_vm0, %v882_v10, 0.0  ;;  %v495_v10 = vld [vmem:[#allocation8 + $0x420] sm:$0xff] }
  0x75   :  { %413 = vmatprep.mubr.f32.mxu0 %v284_v63  ;;  %483 = vmatpush2.msra.mxu1 %v251_v0  ;;  %v144_v63 = vadd.f32 %v143_v53, %v142_v43  ;;  %v158_v0 = vadd.f32 %v157_v54, %v156_v44  ;;  %v502_v43 = vld [vmem:[#allocation8 + $0x458] sm:$0xff] }
  0x76   :  { %484 = vmatprep.mubr.f32.mxu1 %v218_v1  ;;  %414 = vmatmul.mubr.f32.vlgmr.msra.gmra.mxu0 %v283_v2  ;;  %v185_v1 = vrot.slane %v184_v55, 2  ;;  %v509_v2 = vld [vmem:[#allocation8 + $0x490] sm:$0xff]  ;;  %v131_v13 = vrot.slane %v130_v62, 1  ;;  %v498_v53 = vld [vmem:[#allocation8 + $0x438] sm:$0xff] }
  0x77   :  { %485 = vmatmul.mubr.f32.vlgmr.msra.gmra.mxu1 %v217_v3  ;;  %594 = vmatprep.subr.mxu0 %v522_v4  ;;  %v117_v3 = vrot.slane %v116_v57, 1  ;;  %v172_v4 = vadd.f32 %v171_v58, %v170_v48  ;;  %v145_v14 = vrot.slane %v144_v63, 1  ;;  %v159_v18 = vrot.slane %v158_v0, 1  ;;  %v496_v58 = vld [vmem:[#allocation8 + $0x428] sm:$0xff] }
  0x78   :  { %595 = vmatpush1.msra.mxu0 %v521_v5  ;;  %v199_v5 = vrot.slane %v198_v59, 2  ;;  %v186_v19 = vadd.f32 %v185_v1, %v184_v55  ;;  %v497_v55 = vld [vmem:[#allocation8 + $0x430] sm:$0xff] }
  0x79   :  { %596 = vmatprep.subr.mxu0 %v520_v6  ;;  %v212_v6 = vadd.f32 %v211_v60, %v210_v50  ;;  %v173_v22 = vrot.slane %v172_v4, 1  ;;  %v146_v27 = vadd.f32 %v145_v14, %v144_v63  ;;  %v160_v28 = vadd.f32 %v159_v18, %v158_v0  ;;  %v493_v0 = vld [vmem:[#allocation8 + $0x410] sm:$0xff] }
  0x7a   :  { %597 = vmatpush1.msra.mxu0 %v519_v7  ;;  %v508_v7 = vld [vmem:[#allocation8 + $0x488] sm:$0xff]  ;;  %v200_v23 = vadd.f32 %v199_v5, %v198_v59  ;;  %v187_v29 = vrot.slane %v186_v19, 1  ;;  %v120_v50 = vrot.slane %v119_v42, 4  ;;  %v107_v59 = vadd.f32 %v106_v49, %v105_v37  ;;  %v553_v14 = vld [vmem:[#allocation8 + $0x5f0] sm:$0xff] }
  0x7b   :  { %598 = vmatprep.subr.mxu0 %v518_v21  ;;  %v118_v21 = vadd.f32 %v117_v3, %v116_v57  ;;  %v213_v24 = vrot.slane %v212_v6, 2  ;;  %v147_v57 = vsel %vm104_vm0, %v884_v11, 0.0  ;;  %v161_v63 = vsel %vm104_vm0, %v886_v12, 0.0  ;;  %v491_v11 = vld [vmem:[#allocation8 + $0x400] sm:$0xff]  ;;  %v552_v12 = vld [vmem:[#allocation8 + $0x5e8] sm:$0xff] }
  0x7c   :  { %599 = vmatpush1.msra.mxu0 %v517_v26  ;;  %v132_v26 = vadd.f32 %v131_v13, %v130_v62  ;;  %v201_v32 = vrot.slane %v200_v23, 1  ;;  %v188_v35 = vadd.f32 %v187_v29, %v186_v19  ;;  %v121_v60 = vadd.f32 %v120_v50, %v119_v42 }
  0x7d   :  { %600 = vmatprep.subr.mxu0 %v516_v31  ;;  %v174_v31 = vadd.f32 %v173_v22, %v172_v4  ;;  %v214_v33 = vadd.f32 %v213_v24, %v212_v6  ;;  %v148_v62 = vrot.slane %v147_v57, 4  ;;  %v108_v3 = vrot.slane %v107_v59, 2 }
  0x7e   :  { %601 = vmatpush1.msra.mxu0 %v515_v36  ;;  %v585_v36 = vsel %vm571_vm1, %v132_v26, %v118_v21  ;;  %v202_v39 = vadd.f32 %v201_v32, %v200_v23  ;;  %v122_v4 = vrot.slane %v121_v60, 2  ;;  %v162_v5 = vrot.slane %v161_v63, 4  ;;  %v551_v23 = vld [vmem:[#allocation8 + $0x5e0] sm:$0xff]  ;;  %v549_v26 = vld [vmem:[#allocation8 + $0x5d0] sm:$0xff] }
  0x7f   :  { %602 = vmatprep.subr.mxu0 %v514_v41  ;;  %v215_v40 = vrot.slane %v214_v33, 1  ;;  %v586_v41 = vsel %vm573_vm2, %v146_v27, %v585_v36  ;;  %v175_v6 = vsel %vm104_vm0, %v892_v15, 0.0  ;;  %v149_v13 = vadd.f32 %v148_v62, %v147_v57  ;;  %v535_v62 = vld [vmem:[#allocation8 + $0x560] sm:$0xff] }
  0x80   :  { %603 = vmatpush1.msra.mxu0 %v513_v46  ;;  %v587_v44 = vsel %vm575_vm3, %v160_v28, %v586_v41  ;;  %v109_v19 = vadd.f32 %v108_v3, %v107_v59  ;;  %v176_v21 = vrot.slane %v175_v6, 4  ;;  %v189_v22 = vsel %vm104_vm0, %v894_v16, 0.0  ;;  %v547_v16 = vld [vmem:[#allocation8 + $0x5c0] sm:$0xff]  ;;  %v544_v41 = vld [vmem:[#allocation8 + $0x5a8] sm:$0xff]  ;;  %v533_v3 = vld [vmem:[#allocation8 + $0x550] sm:$0xff] }
  0x81   :  { %604 = vmatprep.subr.mxu0 %v512_v51  ;;  %v216_v46 = vadd.f32 %v215_v40, %v214_v33  ;;  %v588_v8 = vsel %vm577_vm4, %v174_v31, %v587_v44  ;;  %v499_v51 = vld [vmem:[#allocation8 + $0x440] sm:$0xff]  ;;  %v163_v24 = vadd.f32 %v162_v5, %v161_v63  ;;  %v150_v15 = vrot.slane %v149_v13, 2 }
  0x82   :  { %605 = vmatpush1.msra.mxu0 %v511_v56  ;;  %v589_v48 = vsel %vm579_vm5, %v188_v35, %v588_v8  ;;  %v134_v56 = vrot.slane %v133_v9, 4  ;;  %v190_v28 = vrot.slane %v189_v22, 4  ;;  %v203_v29 = vsel %vm104_vm0, %v896_v17, 0.0  ;;  %v546_v35 = vld [vmem:[#allocation8 + $0x5b8] sm:$0xff]  ;;  %v543_v44 = vld [vmem:[#allocation8 + $0x5a0] sm:$0xff] }
  0x83   :  { %606 = vmatprep.subr.mxu0 %v510_v61  ;;  %v590_v52 = vsel %vm581_vm6, %v202_v39, %v589_v48  ;;  %v494_v61 = vld [vmem:[#allocation8 + $0x418] sm:$0xff]  ;;  %v110_v31 = vrot.slane %v109_v19, 1  ;;  %v177_v33 = vadd.f32 %v176_v21, %v175_v6  ;;  %v151_v36 = vadd.f32 %v150_v15, %v149_v13  ;;  %v541_v48 = vld [vmem:[#allocation8 + $0x590] sm:$0xff]  ;;  %v531_v6 = vld [vmem:[#allocation8 + $0x540] sm:$0xff] }
  0x84   :  { %607 = vmatpush1.msra.mxu0 %v509_v2  ;;  %v591_v54 = vsel %vm583_vm7, %v216_v46, %v590_v52  ;;  %v135_v1 = vadd.f32 %v134_v56, %v133_v9  ;;  %v492_v2 = vld [vmem:[#allocation8 + $0x408] sm:$0xff]  ;;  %v204_v37 = vrot.slane %v203_v29, 4  ;;  %v191_v40 = vadd.f32 %v190_v28, %v189_v22  ;;  %v542_v46 = vld [vmem:[#allocation8 + $0x598] sm:$0xff]  ;;  %v527_v21 = vld [vmem:[#allocation8 + $0x520] sm:$0xff] }
  0x85   :  { %608 = vmatprep.subr.mxu0 %v508_v7  ;;  %658 = vmatprep.mubr.f32.mxu0 %v591_v54  ;;  %v554_v7 = vld [vmem:[#allocation8 + $0x5f8] sm:$0xff]  ;;  %v111_v42 = vadd.f32 %v110_v31, %v109_v19  ;;  %v152_v8 = vrot.slane %v151_v36, 1  ;;  %v540_v9 = vld [vmem:[#allocation8 + $0x588] sm:$0xff]  ;;  %v671_v28 = vlaneseq }
  0x86   :  { %609 = vmatpush1.msra.mxu0 %v507_v20  ;;  %v136_v18 = vrot.slane %v135_v1, 2  ;;  %v123_v20 = vadd.f32 %v122_v4, %v121_v60  ;;  %v192_v50 = vrot.slane %v191_v40, 2  ;;  %v530_v13 = vld [vmem:[#allocation8 + $0x538] sm:$0xff]  ;;  %v528_v19 = vld [vmem:[#allocation8 + $0x528] sm:$0xff] }
  0x87   :  { %610 = vmatprep.subr.mxu0 %v506_v25  ;;  %v550_v25 = vld [vmem:[#allocation8 + $0x5d8] sm:$0xff]  ;;  %v153_v56 = vadd.f32 %v152_v8, %v151_v36  ;;  %v524_v15 = vld [vmem:[#allocation8 + $0x508] sm:$0xff] }
  0x88   :  { %611 = vmatpush1.msra.mxu0 %v505_v30  ;;  %v137_v27 = vadd.f32 %v136_v18, %v135_v1  ;;  %v548_v30 = vld [vmem:[#allocation8 + $0x5c8] sm:$0xff]  ;;  %v124_v32 = vrot.slane %v123_v20, 1  ;;  %v193_v59 = vadd.f32 %v192_v50, %v191_v40  ;;  %v529_v18 = vld [vmem:[#allocation8 + $0x530] sm:$0xff]  ;;  %v526_v22 = vld [vmem:[#allocation8 + $0x518] sm:$0xff] }
  0x89   :  { %612 = vmatprep.subr.mxu0 %v504_v34  ;;  %v164_v34 = vrot.slane %v163_v24, 2 }
  0x8a   :  { %613 = vmatpush1.msra.mxu0 %v503_v38  ;;  %v545_v38 = vld [vmem:[#allocation8 + $0x5b0] sm:$0xff]  ;;  %v138_v39 = vrot.slane %v137_v27, 1  ;;  %v125_v17 = vadd.f32 %v124_v32, %v123_v20  ;;  %v194_v4 = vrot.slane %v193_v59, 1 }
  0x8b   :  { %614 = vmatprep.subr.mxu0 %v502_v43  ;;  %v178_v43 = vrot.slane %v177_v33, 2 }
  0x8c   :  { %615 = vmatpush1.msra.mxu0 %v501_v45  ;;  %v165_v45 = vadd.f32 %v164_v34, %v163_v24  ;;  %v139_v49 = vadd.f32 %v138_v39, %v137_v27  ;;  %v572_v52 = vsel %vm571_vm1, %v125_v17, %v111_v42  ;;  %v525_v24 = vld [vmem:[#allocation8 + $0x510] sm:$0xff] }
  0x8d   :  { %616 = vmatprep.subr.mxu0 %v500_v47  ;;  %v205_v47 = vadd.f32 %v204_v37, %v203_v29  ;;  %v672_v29 = vshrl.u32 %v671_v28, 7 }
  0x8e   :  { %617 = vmatpush1.msra.mxu0 %v499_v51  ;;  %v179_v51 = vadd.f32 %v178_v43, %v177_v33  ;;  %v166_v54 = vrot.slane %v165_v45, 1  ;;  %v574_v60 = vsel %vm573_vm2, %v139_v49, %v572_v52 }
  0x8f   :  { %618 = vmatprep.subr.mxu0 %v498_v53  ;;  %v539_v53 = vld [vmem:[#allocation8 + $0x580] sm:$0xff]  ;;  %v206_v57 = vrot.slane %v205_v47, 2  ;;  %v673_v32 = vsub.s32 0, %v672_v29  ;;  %v677_v34 = vsub.s32 1, %v672_v29 }
  0x90   :  { %619 = vmatpush1.msra.mxu0 %v497_v55  ;;  %v538_v55 = vld [vmem:[#allocation8 + $0x578] sm:$0xff]  ;;  %v167_v63 = vadd.f32 %v166_v54, %v165_v45 }
  0x91   :  { %620 = vmatprep.subr.mxu0 %v496_v58  ;;  %v537_v58 = vld [vmem:[#allocation8 + $0x570] sm:$0xff]  ;;  %v207_v1 = vadd.f32 %v206_v57, %v205_v47 }
  0x92   :  { %621 = vmatpush1.msra.mxu0 %v495_v10  ;;  %v536_v10 = vld [vmem:[#allocation8 + $0x568] sm:$0xff] }
  0x93   :  { %622 = vmatprep.subr.mxu0 %v494_v61  ;;  %v180_v61 = vrot.slane %v179_v51, 1 }
  0x94   :  { %623 = vmatpush1.msra.mxu0 %v493_v0  ;;  %v534_v0 = vld [vmem:[#allocation8 + $0x558] sm:$0xff] }
  0x95   :  { %624 = vmatprep.subr.mxu0 %v492_v2  ;;  %v576_v2 = vsel %vm575_vm3, %v153_v56, %v574_v60  ;;  %v181_v5 = vadd.f32 %v180_v61, %v179_v51 }
  0x96   :  { %625 = vmatpush1.msra.mxu0 %v491_v11  ;;  %v532_v11 = vld [vmem:[#allocation8 + $0x548] sm:$0xff] }
  0x97   :  { %626 = vmatprep.subr.mxu0 %v554_v7  ;;  %v578_v7 = vsel %vm577_vm4, %v167_v63, %v576_v2 }
  0x98   :  { %627 = vmatpush2.msra.mxu0 %v553_v14  ;;  %v208_v14 = vrot.slane %v207_v1, 1  ;;  %v580_v20 = vsel %vm579_vm5, %v181_v5, %v578_v7 }
  0x99   :  { %628 = vmatprep.subr.mxu0 %v552_v12  ;;  %v195_v12 = vadd.f32 %v194_v4, %v193_v59 }
  0x9a   :  { %629 = vmatpush2.msra.mxu0 %v551_v23  ;;  %v209_v23 = vadd.f32 %v208_v14, %v207_v1 }
  0x9b   :  { %630 = vmatprep.subr.mxu0 %v550_v25  ;;  %v582_v25 = vsel %vm581_vm6, %v195_v12, %v580_v20 }
  0x9c   :  { %631 = vmatpush2.msra.mxu0 %v549_v26  ;;  %v523_v26 = vld [vmem:[#allocation8 + $0x500] sm:$0xff]  ;;  %v584_v27 = vsel %vm583_vm7, %v209_v23, %v582_v25 }
  0x9d   :  { %632 = vmatprep.subr.mxu0 %v548_v30 }
  0x9e   :  { %633 = vmatpush2.msra.mxu0 %v547_v16  ;;  %v669_v16 = vld [vmem:[%s958_s4] sm:$0x3]  ;;  %s799_s4 = scalar_lea.vmem %s692_s16, 256 }
  0x9f   :  { %634 = vmatprep.subr.mxu0 %v546_v35  ;;  %v674_v39 = vrot.slane %v669_v16, %v673_v32  ;;  %v678_v43 = vrot.slane %v669_v16, %v677_v34  ;;  %p800_p6 = scmp.ne.s32.totalorder %s692_s16, %s799_s4  ;;  %p805_p8 = scmp.lt.s32.totalorder %s799_s4, %s799_s4 }
  0xa0   :  { %635 = vmatpush2.msra.mxu0 %v545_v38 }
  0xa1   :  { %636 = vmatprep.subr.mxu0 %v544_v41  ;;  %p806_p9 = por %p805_p8, %p804_p7 }
  0xa2   :  { %637 = vmatpush2.msra.mxu0 %v543_v44 }
  0xa3   :  { %638 = vmatprep.subr.mxu0 %v542_v46  ;;  %p807_p10 = pnand %p806_p9, %p800_p6 }
  0xa4   :  { %639 = vmatpush2.msra.mxu0 %v541_v48 }
  0xa5   :  { %640 = vmatprep.subr.mxu0 %v540_v9 }
  0xa6   :  { %641 = vmatpush2.msra.mxu0 %v539_v53 }
  0xa7   :  { %642 = vmatprep.subr.mxu0 %v538_v55 }
  0xa8   :  { %643 = vmatpush2.msra.mxu0 %v537_v58 }
  0xa9   :  { %644 = vmatprep.subr.mxu0 %v536_v10 }
  0xaa   :  { %645 = vmatpush2.msra.mxu0 %v535_v62 }
  0xab   :  { %646 = vmatprep.subr.mxu0 %v534_v0 }
  0xac   :  { %647 = vmatpush2.msra.mxu0 %v533_v3 }
  0xad   :  { %648 = vmatprep.subr.mxu0 %v532_v11 }
  0xae   :  { %649 = vmatpush2.msra.mxu0 %v531_v6 }
  0xaf   :  { %650 = vmatprep.subr.mxu0 %v530_v13 }
  0xb0   :  { %651 = vmatpush2.msra.mxu0 %v529_v18 }
  0xb1   :  { %652 = vmatprep.subr.mxu0 %v528_v19 }
  0xb2   :  { %653 = vmatpush2.msra.mxu0 %v527_v21 }
  0xb3   :  { %654 = vmatprep.subr.mxu0 %v526_v22 }
  0xb4   :  { %655 = vmatpush2.msra.mxu0 %v525_v24 }
  0xb5   :  { %656 = vmatprep.subr.mxu0 %v524_v15 }
  0xb6   :  { %657 = vmatpush2.msra.mxu0 %v523_v26 }
  0xb7   :  { %659 = vmatmul.mubr.f32.vlgmr.msra.gmra.mxu0 %v584_v27 }
 0x136   :  { %v415_v30 = vpop.f32.mrf.mxu0 }
 0x137   :  { %v486_v31 = vpop.f32.mrf.mxu1 }
 0x138   :  { %v417_v33 = vpop.f32.mrf.mxu0  ;;  %v487_v37 = vadd.f32 %v486_v31, %v415_v30 }
 0x139   :  { %v488_v35 = vpop.f32.mrf.mxu1 }
 0x13a   :  { %v489_v41 = vadd.f32 %v488_v35, %v417_v33 }
 0x177   :  { %v660_v36 = vpop.f32.mrf.mxu0 }
 0x178   :  { %v665_v38 = vmul.f32 0.25, %v660_v36 }
 0x179   :  { %v662_v40 = vpop.f32.mrf.mxu0 }
 0x17a   :  { %v667_v42 = vadd.f32 %v665_v38, %v487_v37  ;;  %v666_v17 = vmul.f32 0.25, %v662_v40 }
 0x17c   :  { %v681_v44 = vadd.f32 %v674_v39, %v667_v42  ;;  %v668_v45 = vadd.f32 %v666_v17, %v489_v41 }
 0x17e   :  { %683 = vst [vmem:[#allocation10] sm:$0xff] %v681_v44  ;;  %v682_v46 = vadd.f32 %v678_v43, %v668_v45 }
 0x180   :  { %684 = vst [vmem:[#allocation10 + $0x8] sm:$0xff] %v682_v46 }
 0x181   :  { %810 = shalt.err (!%p807_p10)
}
 0x182   :  { %694 = dma.vmem_to_hbm [thread:$0]  %s692_s16, 256, %s959_s5, [#allocation4]  }
 0x183   :  { %825 = dma.done.wait [#allocation4], 256  }
 0x184   :  { %826 = vsyncadd [#allocation4], 4294967040 }
 0x185   :  { %698 = vsyncpa [#allocation3], 1 }
 0x186   :  { %699 = vsyncpa [#allocation6], 1 }
 0x187   :  { %700 = vsyncpa [#allocation9], 1 }
 0x188   :  { %701 = vsyncpa [#allocation4], 1 }

</bundles_post_ra>
